<compile_context>
chip_gen: v6e
topology: v6e:2x2x1
jax: 0.10.0
libtpu: 0.0.40
codegen_flags: <defaults>
</compile_context>

<pallas_src>
import jax
import jax.numpy as jnp
from jax.experimental import pallas as pl
from jax.experimental.pallas import tpu as pltpu


def _combiner_kernel(z_ref, h_ref, w1_ref, b1_ref, wout_ref, bout_ref,
                     loc_ref, scale_ref):
    # Inputs may be bf16; matmuls accumulate in f32, activations run in f32.
    z = z_ref[...]
    h_rnn = h_ref[...].astype(jnp.float32)

    # Linear(z_dim -> rnn_dim) + tanh.  The 0.5 factor of the original
    # h_combined is folded into wout (done once in the wrapper), so here we
    # only need tanh(hidden) + h_rnn.
    hidden = (jnp.dot(z, w1_ref[...], preferred_element_type=jnp.float32)
              + b1_ref[...].astype(jnp.float32))
    s = jnp.tanh(hidden) + h_rnn

    # Fused Linear(rnn_dim -> 2*z_dim): [loc | scale_pre] in one MXU pass.
    fused = (jnp.dot(s.astype(wout_ref.dtype), wout_ref[...],
                     preferred_element_type=jnp.float32)
             + bout_ref[...].astype(jnp.float32))

    z_dim = loc_ref.shape[-1]
    loc = fused[:, :z_dim]
    pre = fused[:, z_dim:]
    # Numerically stable softplus, only on the scale half (half the EUP work).
    sp = jnp.maximum(pre, 0.0) + jnp.log1p(jnp.exp(-jnp.abs(pre)))

    loc_ref[...] = loc.astype(loc_ref.dtype)
    scale_ref[...] = sp.astype(scale_ref.dtype)


def _choose_tiling(B, requested, sublane, bytes_per_row, vmem_budget=4 << 20):
    """Return (tb, grid_len, padded_B).

    - small B  -> single full block (grid=1), no per-step tax.
    - large B  -> even grid >= 2 (v7x megacore sharding of the 'parallel' axis),
                  tb capped so double-buffered streamed blocks stay well under
                  the scoped-VMEM default (16 MiB v5e / 32 MiB v6e+v7x; v7x has
                  only 64 MiB physical).
    - non-divisible B is handled by padding up to tb*grid in the wrapper.
    """
    def round_up(x, m):
        return ((x + m - 1) // m) * m

    def cdiv(a, b):
        return -(-a // b)

    vmem_cap = max(sublane,
                   (vmem_budget // max(bytes_per_row, 1)) // sublane * sublane)
    target = requested if requested is not None else 4096
    target = max(sublane, min(target, vmem_cap))

    if B <= target:
        tb = round_up(B, sublane)
        return tb, 1, tb

    grid = max(2, cdiv(B, target))
    if grid % 2:
        grid += 1                      # even grid -> both v7x TCs get work
    tb = round_up(cdiv(B, grid), sublane)
    return tb, grid, tb * grid


def prepare_combiner_params(params, compute_dtype=jnp.float32):
    """Once-per-model weight prep (hoisted out of the per-step forward):
    concat loc/scale projections, fold the 0.5 of h_combined into the fused
    output weight, and cast weights to the compute dtype."""
    w1, b1, wloc, bloc, wscl, bscl = params
    cdt = jnp.dtype(compute_dtype)
    return dict(
        compute_dtype=cdt,
        w1=jnp.asarray(w1, cdt),                                   # (z, rnn)
        b1=jnp.asarray(b1, jnp.float32).reshape(1, -1),            # (1, rnn)
        wout=(0.5 * jnp.concatenate([wloc, wscl], axis=1)).astype(cdt),  # (rnn, 2z)
        bout=jnp.concatenate([bloc, bscl], axis=1)
             .astype(jnp.float32).reshape(1, -1),                  # (1, 2z)
    )


def combiner_forward(z_t_1, h_rnn, params, *, batch_tile=None,
                     out_dtype=jnp.float32):
    """z_t_1: (B, z_dim), h_rnn: (B, rnn_dim) -> (loc, scale), each (B, z_dim).

    `params` is either the raw 6-tuple or (preferably, for per-timestep use)
    the dict from prepare_combiner_params()."""
    if not isinstance(params, dict):
        params = prepare_combiner_params(params)
    cdt = params["compute_dtype"]
    w1, b1 = params["w1"], params["b1"]
    wout, bout = params["wout"], params["bout"]

    B, z_dim = z_t_1.shape
    rnn_dim = h_rnn.shape[1]
    out_w = 2 * z_dim
    odt = jnp.dtype(out_dtype)

    sublane = 16 if cdt == jnp.bfloat16 else 8
    bytes_per_row = (z_dim + rnn_dim) * cdt.itemsize + out_w * odt.itemsize
    tb, grid_len, Bp = _choose_tiling(B, batch_tile, sublane, bytes_per_row)

    # Cast the dominant HBM input streams to the compute dtype; pad ragged B.
    z = jnp.asarray(z_t_1, cdt)
    h = jnp.asarray(h_rnn, cdt)
    if Bp != B:
        z = jnp.pad(z, ((0, Bp - B), (0, 0)))
        h = jnp.pad(h, ((0, Bp - B), (0, 0)))

    z_spec = pl.BlockSpec((tb, z_dim), lambda i: (i, 0))
    h_spec = pl.BlockSpec((tb, rnn_dim), lambda i: (i, 0))
    w1_spec = pl.BlockSpec((z_dim, rnn_dim), lambda i: (0, 0))
    b1_spec = pl.BlockSpec((1, rnn_dim), lambda i: (0, 0))
    wout_spec = pl.BlockSpec((rnn_dim, out_w), lambda i: (0, 0))
    bout_spec = pl.BlockSpec((1, out_w), lambda i: (0, 0))
    out_spec = pl.BlockSpec((tb, z_dim), lambda i: (i, 0))

    loc, scale = pl.pallas_call(
        _combiner_kernel,
        out_shape=(jax.ShapeDtypeStruct((Bp, z_dim), odt),
                   jax.ShapeDtypeStruct((Bp, z_dim), odt)),
        grid_spec=pltpu.PrefetchScalarGridSpec(
            num_scalar_prefetch=0,
            grid=(grid_len,),
            in_specs=[z_spec, h_spec, w1_spec, b1_spec, wout_spec, bout_spec],
            out_specs=[out_spec, out_spec],
        ),
        compiler_params=pltpu.CompilerParams(
            dimension_semantics=("parallel",)),
    )(z, h, w1, b1, wout, bout)

    if Bp != B:
        loc = loc[:B]
        scale = scale[:B]
    return loc, scale


def init_combiner_params(key, z_dim, rnn_dim):
    """Deterministic PyTorch-style Linear init (uniform +-1/sqrt(fan_in)).
    Weights stored as (in_features, out_features) for the kernel."""
    ks = jax.random.split(key, 6)

    def uniform(k, shape, fan_in):
        bound = 1.0 / jnp.sqrt(float(fan_in))
        return jax.random.uniform(k, shape, jnp.float32, -bound, bound)

    w1 = uniform(ks[0], (z_dim, rnn_dim), z_dim)
    b1 = uniform(ks[1], (1, rnn_dim), z_dim)
    wloc = uniform(ks[2], (rnn_dim, z_dim), rnn_dim)
    bloc = uniform(ks[3], (1, z_dim), rnn_dim)
    wscl = uniform(ks[4], (rnn_dim, z_dim), rnn_dim)
    bscl = uniform(ks[5], (1, z_dim), rnn_dim)
    return (w1, b1, wloc, bloc, wscl, bscl)


def combiner_reference(z_t_1, h_rnn, params):
    w1, b1, wloc, bloc, wscl, bscl = params
    h_combined = 0.5 * (jnp.tanh(z_t_1 @ w1 + b1) + h_rnn)
    loc = h_combined @ wloc + bloc
    scale = jax.nn.softplus(h_combined @ wscl + bscl)
    return loc, scale


if __name__ == "__main__":
    B, z_dim, rnn_dim = 128, 32, 64

    key = jax.random.PRNGKey(0)
    k_z, k_h, k_p = jax.random.split(key, 3)
    z_t_1 = jax.random.normal(k_z, (B, z_dim), jnp.float32)
    h_rnn = jax.random.normal(k_h, (B, rnn_dim), jnp.float32)
    params = init_combiner_params(k_p, z_dim, rnn_dim)

    # Hoisted, once-per-model weight prep (concat + 0.5 fold + casts).
    prep_f32 = prepare_combiner_params(params, jnp.float32)

    # Default tiling: B=128 is small -> one block, grid=(1,), zero step tax.
    loc, scale = combiner_forward(z_t_1, h_rnn, prep_f32)
    jax.block_until_ready((loc, scale))
    loc_ref, scale_ref = combiner_reference(z_t_1, h_rnn, params)
    assert jnp.allclose(loc, loc_ref, atol=1e-5, rtol=1e-5)
    assert jnp.allclose(scale, scale_ref, atol=1e-5, rtol=1e-5)

    # Ragged batch: B=100 with a small tile target -> padded even grid of 4,
    # exercising pipelining + megacore sharding + the pad/slice path.
    B2 = 100
    z2 = jax.random.normal(k_z, (B2, z_dim), jnp.float32)
    h2 = jax.random.normal(k_h, (B2, rnn_dim), jnp.float32)
    loc2, scale2 = combiner_forward(z2, h2, prep_f32, batch_tile=48)
    jax.block_until_ready((loc2, scale2))
    loc2_ref, scale2_ref = combiner_reference(z2, h2, params)
    assert jnp.allclose(loc2, loc2_ref, atol=1e-5, rtol=1e-5)
    assert jnp.allclose(scale2, scale2_ref, atol=1e-5, rtol=1e-5)

    # bf16 I/O path (halves input HBM traffic; f32 accumulation) -> looser tol.
    prep_bf16 = prepare_combiner_params(params, jnp.bfloat16)
    loc3, scale3 = combiner_forward(z_t_1, h_rnn, prep_bf16)
    jax.block_until_ready((loc3, scale3))
    assert jnp.allclose(loc3, loc_ref, atol=5e-2, rtol=5e-2)
    assert jnp.allclose(scale3, scale_ref, atol=5e-2, rtol=5e-2)

    print("KERNEL_OK")
</pallas_src>

<mosaic_0001>
module attributes {stable_mosaic.version = 11 : i64} {
  func.func @_combiner_kernel(%arg0: i32, %arg1: memref<128x32xf32, #tpu.memory_space<vmem>>, %arg2: memref<128x64xf32, #tpu.memory_space<vmem>>, %arg3: memref<32x64xf32, #tpu.memory_space<vmem>>, %arg4: memref<1x64xf32, #tpu.memory_space<vmem>>, %arg5: memref<64x64xf32, #tpu.memory_space<vmem>>, %arg6: memref<1x64xf32, #tpu.memory_space<vmem>>, %arg7: memref<128x32xf32, #tpu.memory_space<vmem>>, %arg8: memref<128x32xf32, #tpu.memory_space<vmem>>) attributes {dimension_semantics = [#tpu.dimension_semantics<parallel>], iteration_bounds = array<i64: 1>, scalar_prefetch = 0 : i64, scratch_operands = 0 : i64, tpu.core_type = #tpu.core_type<tc>, window_params = [{transform_indices = @transform_0, window_bounds = array<i64: 128, 32>}, {transform_indices = @transform_1, window_bounds = array<i64: 128, 64>}, {pipeline_mode = #tpu.pipeline_mode<synchronous>, transform_indices = @transform_2, window_bounds = array<i64: 32, 64>}, {pipeline_mode = #tpu.pipeline_mode<synchronous>, transform_indices = @transform_3, window_bounds = array<i64: 1, 64>}, {pipeline_mode = #tpu.pipeline_mode<synchronous>, transform_indices = @transform_4, window_bounds = array<i64: 64, 64>}, {pipeline_mode = #tpu.pipeline_mode<synchronous>, transform_indices = @transform_5, window_bounds = array<i64: 1, 64>}, {transform_indices = @transform_6, window_bounds = array<i64: 128, 32>}, {transform_indices = @transform_7, window_bounds = array<i64: 128, 32>}]} {
    %c0 = arith.constant 0 : index
    %c0_0 = arith.constant 0 : index
    %0 = vector.load %arg1[%c0, %c0_0] : memref<128x32xf32, #tpu.memory_space<vmem>>, vector<128x32xf32>
    %c0_1 = arith.constant 0 : index
    %c0_2 = arith.constant 0 : index
    %1 = vector.load %arg2[%c0_1, %c0_2] : memref<128x64xf32, #tpu.memory_space<vmem>>, vector<128x64xf32>
    %c0_3 = arith.constant 0 : index
    %c0_4 = arith.constant 0 : index
    %2 = vector.load %arg3[%c0_3, %c0_4] : memref<32x64xf32, #tpu.memory_space<vmem>>, vector<32x64xf32>
    %cst = arith.constant dense<0.000000e+00> : vector<128x64xf32>
    %3 = tpu.matmul %0, %2, %cst {dimension_numbers = #tpu.dot_dimension_numbers<[1], [0], [0], [1], [0, 0, 1, 1], [], []>} : vector<128x32xf32>, vector<32x64xf32>, vector<128x64xf32> -> vector<128x64xf32>
    %c0_5 = arith.constant 0 : index
    %c0_6 = arith.constant 0 : index
    %4 = vector.load %arg4[%c0_5, %c0_6] : memref<1x64xf32, #tpu.memory_space<vmem>>, vector<1x64xf32>
    %5 = vector.broadcast %4 : vector<1x64xf32> to vector<128x64xf32>
    %6 = arith.addf %3, %5 : vector<128x64xf32>
    %7 = math.tanh %6 : vector<128x64xf32>
    %8 = arith.addf %7, %1 : vector<128x64xf32>
    %c0_7 = arith.constant 0 : index
    %c0_8 = arith.constant 0 : index
    %9 = vector.load %arg5[%c0_7, %c0_8] : memref<64x64xf32, #tpu.memory_space<vmem>>, vector<64x64xf32>
    %cst_9 = arith.constant dense<0.000000e+00> : vector<128x64xf32>
    %10 = tpu.matmul %8, %9, %cst_9 {dimension_numbers = #tpu.dot_dimension_numbers<[1], [0], [0], [1], [0, 0, 1, 1], [], []>} : vector<128x64xf32>, vector<64x64xf32>, vector<128x64xf32> -> vector<128x64xf32>
    %c0_10 = arith.constant 0 : index
    %c0_11 = arith.constant 0 : index
    %11 = vector.load %arg6[%c0_10, %c0_11] : memref<1x64xf32, #tpu.memory_space<vmem>>, vector<1x64xf32>
    %12 = vector.broadcast %11 : vector<1x64xf32> to vector<128x64xf32>
    %13 = arith.addf %10, %12 : vector<128x64xf32>
    %14 = vector.extract_strided_slice %13 {offsets = [0, 0], sizes = [128, 32], strides = [1, 1]} : vector<128x64xf32> to vector<128x32xf32>
    %15 = vector.extract_strided_slice %13 {offsets = [0, 32], sizes = [128, 32], strides = [1, 1]} : vector<128x64xf32> to vector<128x32xf32>
    %cst_12 = arith.constant 0.000000e+00 : f32
    %16 = vector.broadcast %cst_12 : f32 to vector<128x32xf32>
    %17 = arith.maximumf %15, %16 : vector<128x32xf32>
    %18 = math.absf %15 : vector<128x32xf32>
    %cst_13 = arith.constant 0.000000e+00 : f32
    %19 = vector.broadcast %cst_13 : f32 to vector<128x32xf32>
    %20 = arith.subf %19, %18 : vector<128x32xf32>
    %21 = math.exp %20 : vector<128x32xf32>
    %22 = math.log1p %21 : vector<128x32xf32>
    %23 = arith.addf %17, %22 : vector<128x32xf32>
    %c0_14 = arith.constant 0 : index
    %c0_15 = arith.constant 0 : index
    %24 = vector.load %arg7[%c0_14, %c0_15] : memref<128x32xf32, #tpu.memory_space<vmem>>, vector<128x32xf32>
    tpu.vector_store %arg7[%c0_14, %c0_15], %14 {strides = array<i32>} : memref<128x32xf32, #tpu.memory_space<vmem>>, vector<128x32xf32>,
    %c0_16 = arith.constant 0 : index
    %c0_17 = arith.constant 0 : index
    %25 = vector.load %arg8[%c0_16, %c0_17] : memref<128x32xf32, #tpu.memory_space<vmem>>, vector<128x32xf32>
    tpu.vector_store %arg8[%c0_16, %c0_17], %23 {strides = array<i32>} : memref<128x32xf32, #tpu.memory_space<vmem>>, vector<128x32xf32>,
    return
  }
  func.func @transform_0(%arg0: i32) -> (i32, i32) {
    %c0_i32 = arith.constant 0 : i32
    %c0_i32_0 = arith.constant 0 : i32
    return %arg0, %c0_i32 : i32, i32
  }
  func.func @transform_1(%arg0: i32) -> (i32, i32) {
    %c0_i32 = arith.constant 0 : i32
    %c0_i32_0 = arith.constant 0 : i32
    return %arg0, %c0_i32 : i32, i32
  }
  func.func @transform_2(%arg0: i32) -> (i32, i32) {
    %c0_i32 = arith.constant 0 : i32
    %c0_i32_0 = arith.constant 0 : i32
    %c0_i32_1 = arith.constant 0 : i32
    return %c0_i32, %c0_i32_0 : i32, i32
  }
  func.func @transform_3(%arg0: i32) -> (i32, i32) {
    %c0_i32 = arith.constant 0 : i32
    %c0_i32_0 = arith.constant 0 : i32
    %c0_i32_1 = arith.constant 0 : i32
    return %c0_i32, %c0_i32_0 : i32, i32
  }
  func.func @transform_4(%arg0: i32) -> (i32, i32) {
    %c0_i32 = arith.constant 0 : i32
    %c0_i32_0 = arith.constant 0 : i32
    %c0_i32_1 = arith.constant 0 : i32
    return %c0_i32, %c0_i32_0 : i32, i32
  }
  func.func @transform_5(%arg0: i32) -> (i32, i32) {
    %c0_i32 = arith.constant 0 : i32
    %c0_i32_0 = arith.constant 0 : i32
    %c0_i32_1 = arith.constant 0 : i32
    return %c0_i32, %c0_i32_0 : i32, i32
  }
  func.func @transform_6(%arg0: i32) -> (i32, i32) {
    %c0_i32 = arith.constant 0 : i32
    %c0_i32_0 = arith.constant 0 : i32
    return %arg0, %c0_i32 : i32, i32
  }
  func.func @transform_7(%arg0: i32) -> (i32, i32) {
    %c0_i32 = arith.constant 0 : i32
    %c0_i32_0 = arith.constant 0 : i32
    return %arg0, %c0_i32 : i32, i32
  }
}

</mosaic_0001>

<bundles_post_ra>
// kernel: tpu_custom_call.1
= control target key start
LH: loop header
LB: loop body
LE: loop exit
PB: predicated region body
PF: predicated region fallthrough
CT: control target
= control target key end

     0   :  { %vm68_vm0 = vcmask 261120   ;;  %vm309_vm1 = vcmask 523264   ;;  %s1757_s2 = inlined_call_operand.vmem [shape: f32[32,64], index: 2, kind: input, shape index: {}]   ;;  %s1758_s0 = inlined_call_operand.vmem [shape: f32[128,32], index: 0, kind: input, shape index: {}]   ;;  %s1759_s4 = inlined_call_operand.vmem [shape: f32[64,64], index: 4, kind: input, shape index: {}]   ;;  %s1760_s3 = inlined_call_operand.vmem [shape: f32[1,64], index: 3, kind: input, shape index: {}]   ;;  %s1761_s1 = inlined_call_operand.vmem [shape: f32[128,64], index: 1, kind: input, shape index: {}]   ;;  %s1762_s5 = inlined_call_operand.vmem [shape: f32[1,64], index: 5, kind: input, shape index: {}]   ;;  %s1763_s6 = inlined_call_operand.vmem [shape: f32[128,32], index: 6, kind: output, shape index: {0}]   ;;  %s1764_s7 = inlined_call_operand.vmem [shape: f32[128,32], index: 7, kind: output, shape index: {1}]  }
   0x1   :  { %v60_v0 = vld [vmem:[%s1757_s2 + $0x18] sm:$0xff]  ;;  %v59_v1 = vld [vmem:[%s1757_s2 + $0x10] sm:$0xff]  ;;  %v25_v2 = vld [vmem:[%s1758_s0] sm:$0xff] }
   0x2   :  { %925 = vmatprep.subr.mxu0 %v60_v0  ;;  %v58_v3 = vld [vmem:[%s1757_s2 + $0x8] sm:$0xff]  ;;  %933 = vmatprep.mubr.msk.f32.mxu0 %vm68_vm0, %v25_v2  ;;  %v57_v4 = vld [vmem:[%s1757_s2] sm:$0xff]  ;;  %v301_v6 = vld [vmem:[%s1759_s4 + $0x38] sm:$0xff] }
   0x3   :  { %926 = vmatpush3.msra.mxu0 %v60_v0  ;;  %v26_v5 = vld [vmem:[%s1758_s0 + $0x8] sm:$0xff]  ;;  %v27_v7 = vld [vmem:[%s1758_s0 + $0x10] sm:$0xff]  ;;  %997 = vmatprep.subr.mxu1 %v301_v6  ;;  %v28_v9 = vld [vmem:[%s1758_s0 + $0x18] sm:$0xff] }
   0x4   :  { %927 = vmatprep.subr.mxu0 %v59_v1  ;;  %v300_v8 = vld [vmem:[%s1759_s4 + $0x30] sm:$0xff]  ;;  %1005 = vmatpush3.msra.mxu1 %v301_v6  ;;  %v29_v10 = vld [vmem:[%s1758_s0 + $0x20] sm:$0xff]  ;;  %v30_v11 = vld [vmem:[%s1758_s0 + $0x28] sm:$0xff] }
   0x5   :  { %928 = vmatpush3.msra.mxu0 %v59_v1  ;;  %998 = vmatprep.subr.mxu1 %v300_v8  ;;  %v31_v12 = vld [vmem:[%s1758_s0 + $0x30] sm:$0xff]  ;;  %v32_v13 = vld [vmem:[%s1758_s0 + $0x38] sm:$0xff]  ;;  %v33_v14 = vld [vmem:[%s1758_s0 + $0x40] sm:$0xff] }
   0x6   :  { %929 = vmatprep.subr.mxu0 %v58_v3  ;;  %1006 = vmatpush3.msra.mxu1 %v300_v8  ;;  %v34_v15 = vld [vmem:[%s1758_s0 + $0x48] sm:$0xff]  ;;  %v35_v16 = vld [vmem:[%s1758_s0 + $0x50] sm:$0xff]  ;;  %v36_v17 = vld [vmem:[%s1758_s0 + $0x58] sm:$0xff] }
   0x7   :  { %930 = vmatpush3.msra.mxu0 %v58_v3  ;;  %v37_v18 = vld [vmem:[%s1758_s0 + $0x60] sm:$0xff]  ;;  %v38_v19 = vld [vmem:[%s1758_s0 + $0x68] sm:$0xff]  ;;  %v39_v20 = vld [vmem:[%s1758_s0 + $0x70] sm:$0xff] }
   0x8   :  { %931 = vmatprep.subr.mxu0 %v57_v4  ;;  %v40_v21 = vld [vmem:[%s1758_s0 + $0x78] sm:$0xff]  ;;  %v299_v22 = vld [vmem:[%s1759_s4 + $0x28] sm:$0xff]  ;;  %v298_v23 = vld [vmem:[%s1759_s4 + $0x20] sm:$0xff] }
   0x9   :  { %932 = vmatpush3.msra.mxu0 %v57_v4  ;;  %999 = vmatprep.subr.mxu1 %v299_v22  ;;  %v297_v24 = vld [vmem:[%s1759_s4 + $0x18] sm:$0xff]  ;;  %v296_v25 = vld [vmem:[%s1759_s4 + $0x10] sm:$0xff]  ;;  %v295_v26 = vld [vmem:[%s1759_s4 + $0x8] sm:$0xff] }
   0xa   :  { %934 = vmatmul.mubr.msk.f32.vlgmr.msra.gmra.mxu0 %vm68_vm0, %v26_v5  ;;  %957 = vmatprep.subr.mxu0 %v301_v6  ;;  %v294_v27 = vld [vmem:[%s1759_s4] sm:$0xff]  ;;  %v42_v48 = vld [vmem:[%s1761_s1 + $0x8] sm:$0xff]  ;;  %v43_v56 = vld [vmem:[%s1761_s1 + $0x10] sm:$0xff] }
   0xb   :  { %936 = vmatprep.mubr.msk.f32.mxu0 %vm68_vm0, %v27_v7  ;;  %958 = vmatpush3.msra.mxu0 %v301_v6  ;;  %v1254_v28 = vld [vmem:[%s1760_s3] ss:$0 sm:$0xff]  ;;  %v44_v59 = vld [vmem:[%s1761_s1 + $0x18] sm:$0xff]  ;;  %v46_v0 = vld [vmem:[%s1761_s1 + $0x28] sm:$0xff] }
   0xc   :  { %959 = vmatprep.subr.mxu0 %v300_v8  ;;  %1007 = vmatpush3.msra.mxu1 %v299_v22  ;;  %v41_v46 = vld [vmem:[%s1761_s1] sm:$0xff] }
   0xd   :  { %960 = vmatpush3.msra.mxu0 %v300_v8  ;;  %1000 = vmatprep.subr.mxu1 %v298_v23  ;;  %v45_v4 = vld [vmem:[%s1761_s1 + $0x20] sm:$0xff] }
   0xe   :  { %937 = vmatmul.mubr.msk.f32.gmra.mxu0 %vm68_vm0, %v28_v9  ;;  %961 = vmatprep.subr.mxu0 %v299_v22 }
   0xf   :  { %939 = vmatprep.mubr.msk.f32.mxu0 %vm68_vm0, %v29_v10  ;;  %962 = vmatpush3.msra.mxu0 %v299_v22 }
  0x10   :  { %963 = vmatprep.subr.mxu0 %v298_v23  ;;  %1008 = vmatpush3.msra.mxu1 %v298_v23 }
  0x11   :  { %964 = vmatpush3.msra.mxu0 %v298_v23  ;;  %1001 = vmatprep.subr.mxu1 %v297_v24  ;;  %v49_v23 = vld [vmem:[%s1761_s1 + $0x40] sm:$0xff] }
  0x12   :  { %940 = vmatmul.mubr.msk.f32.gmra.mxu0 %vm68_vm0, %v30_v11  ;;  %965 = vmatprep.subr.mxu0 %v297_v24  ;;  %v48_v11 = vld [vmem:[%s1761_s1 + $0x38] sm:$0xff] }
  0x13   :  { %942 = vmatprep.mubr.msk.f32.mxu0 %vm68_vm0, %v31_v12  ;;  %966 = vmatpush3.msra.mxu0 %v297_v24 }
  0x14   :  { %1009 = vmatpush3.msra.mxu1 %v297_v24  ;;  %967 = vmatprep.subr.mxu0 %v296_v25 }
  0x15   :  { %1002 = vmatprep.subr.mxu1 %v296_v25  ;;  %968 = vmatpush3.msra.mxu0 %v296_v25 }
  0x16   :  { %943 = vmatmul.mubr.msk.f32.gmra.mxu0 %vm68_vm0, %v32_v13  ;;  %1010 = vmatpush3.msra.mxu1 %v296_v25 }
  0x17   :  { %945 = vmatprep.mubr.msk.f32.mxu0 %vm68_vm0, %v33_v14  ;;  %969 = vmatprep.subr.mxu0 %v295_v26  ;;  %v47_v14 = vld [vmem:[%s1761_s1 + $0x30] sm:$0xff] }
  0x18   :  { %1003 = vmatprep.subr.mxu1 %v295_v26  ;;  %970 = vmatpush3.msra.mxu0 %v295_v26 }
  0x19   :  { %1011 = vmatpush3.msra.mxu1 %v295_v26  ;;  %971 = vmatprep.subr.mxu0 %v294_v27 }
  0x1a   :  { %946 = vmatmul.mubr.msk.f32.gmra.mxu0 %vm68_vm0, %v34_v15  ;;  %1004 = vmatprep.subr.mxu1 %v294_v27 }
  0x1b   :  { %948 = vmatprep.mubr.msk.f32.mxu0 %vm68_vm0, %v35_v16  ;;  %972 = vmatpush3.msra.mxu0 %v294_v27 }
  0x1c   :  { %1012 = vmatpush3.msra.mxu1 %v294_v27  ;;  %v52_v27 = vld [vmem:[%s1761_s1 + $0x58] sm:$0xff] }
  0x1e   :  { %949 = vmatmul.mubr.msk.f32.gmra.mxu0 %vm68_vm0, %v36_v17 }
  0x1f   :  { %951 = vmatprep.mubr.msk.f32.mxu0 %vm68_vm0, %v37_v18 }
  0x22   :  { %952 = vmatmul.mubr.msk.f32.gmra.mxu0 %vm68_vm0, %v38_v19 }
  0x23   :  { %954 = vmatprep.mubr.msk.f32.mxu0 %vm68_vm0, %v39_v20 }
  0x26   :  { %955 = vmatmul.mubr.msk.f32.gmra.mxu0 %vm68_vm0, %v40_v21  ;;  %v50_v21 = vld [vmem:[%s1761_s1 + $0x48] sm:$0xff] }
  0xca   :  { %v935_v29 = vpop.f32.mrf.mxu0 }
  0xcb   :  { %v189_v30 = vadd.f32 %v935_v29, %v1254_v28  ;;  %v51_v29 = vld [vmem:[%s1761_s1 + $0x50] sm:$0xff] }
  0xcc   :  { %v183_v31 = vpop.f32.mrf.mxu0 }
  0xcd   :  { %v184_v32 = vadd.f32 %v1254_v28, %v183_v31  ;;  %1014 = vtanh.f32 %v189_v30 }
  0xce   :  { %v938_v33 = vpop.f32.mrf.mxu0 }
  0xcf   :  { %1016 = vtanh.f32 %v184_v32  ;;  %v199_v34 = vadd.f32 %v938_v33, %v1254_v28  ;;  %v54_v33 = vld [vmem:[%s1761_s1 + $0x68] sm:$0xff] }
  0xd0   :  { %v193_v35 = vpop.f32.mrf.mxu0 }
  0xd1   :  { %v194_v36 = vadd.f32 %v1254_v28, %v193_v35  ;;  %1018 = vtanh.f32 %v199_v34  ;;  %v53_v35 = vld [vmem:[%s1761_s1 + $0x60] sm:$0xff] }
  0xd2   :  { %v941_v37 = vpop.f32.mrf.mxu0 }
  0xd3   :  { %1020 = vtanh.f32 %v194_v36  ;;  %v209_v38 = vadd.f32 %v941_v37, %v1254_v28 }
  0xd4   :  { %v203_v39 = vpop.f32.mrf.mxu0 }
  0xd5   :  { %1022 = vtanh.f32 %v209_v38  ;;  %v204_v40 = vadd.f32 %v1254_v28, %v203_v39  ;;  %v56_v39 = vld [vmem:[%s1761_s1 + $0x78] sm:$0xff] }
  0xd6   :  { %v944_v41 = vpop.f32.mrf.mxu0 }
  0xd7   :  { %1024 = vtanh.f32 %v204_v40  ;;  %v219_v42 = vadd.f32 %v944_v41, %v1254_v28  ;;  %v55_v41 = vld [vmem:[%s1761_s1 + $0x70] sm:$0xff] }
  0xd8   :  { %v213_v43 = vpop.f32.mrf.mxu0 }
  0xd9   :  { %1026 = vtanh.f32 %v219_v42  ;;  %v214_v44 = vadd.f32 %v1254_v28, %v213_v43 }
  0xda   :  { %v947_v45 = vpop.f32.mrf.mxu0  ;;  %v1015_v47 = vpop.eup %1014 }
  0xdb   :  { %1028 = vtanh.f32 %v214_v44  ;;  %v229_v49 = vadd.f32 %v947_v45, %v1254_v28  ;;  %v279_v54 = vadd.f32 %v1015_v47, %v42_v48  ;;  %v1339_v45 = vld [vmem:[%s1762_s5] ss:$0 sm:$0xff] }
  0xdc   :  { %v1017_v50 = vpop.eup %1016  ;;  %v223_v51 = vpop.f32.mrf.mxu0 }
  0xdd   :  { %1030 = vtanh.f32 %v229_v49  ;;  %v224_v52 = vadd.f32 %v1254_v28, %v223_v51  ;;  %v278_v53 = vadd.f32 %v1017_v50, %v41_v46 }
  0xde   :  { %v950_v55 = vpop.f32.mrf.mxu0  ;;  %v1019_v57 = vpop.eup %1018 }
  0xdf   :  { %1032 = vtanh.f32 %v224_v52  ;;  %v239_v58 = vadd.f32 %v950_v55, %v1254_v28  ;;  %973 = vmatprep.mubr.msk.f32.mxu0 %vm309_vm1, %v278_v53  ;;  %v281_v3 = vadd.f32 %v1019_v57, %v44_v59 }
  0xe0   :  { %v1021_v60 = vpop.eup %1020  ;;  %v233_v61 = vpop.f32.mrf.mxu0  ;;  %974 = vmatmul.mubr.msk.f32.vlgmr.msra.gmra.mxu0 %vm309_vm1, %v279_v54 }
  0xe1   :  { %1034 = vtanh.f32 %v239_v58  ;;  %v234_v62 = vadd.f32 %v1254_v28, %v233_v61  ;;  %v280_v63 = vadd.f32 %v1021_v60, %v43_v56 }
  0xe2   :  { %v1023_v1 = vpop.eup %1022  ;;  %v953_v2 = vpop.f32.mrf.mxu0 }
  0xe3   :  { %1036 = vtanh.f32 %v234_v62  ;;  %v249_v5 = vadd.f32 %v953_v2, %v1254_v28  ;;  %976 = vmatprep.mubr.msk.f32.mxu1 %vm309_vm1, %v280_v63  ;;  %v283_v8 = vadd.f32 %v1023_v1, %v46_v0 }
  0xe4   :  { %v1025_v6 = vpop.eup %1024  ;;  %v243_v7 = vpop.f32.mrf.mxu0  ;;  %977 = vmatmul.mubr.msk.f32.vlgmr.msra.gmra.mxu1 %vm309_vm1, %v281_v3 }
  0xe5   :  { %1038 = vtanh.f32 %v249_v5  ;;  %v244_v9 = vadd.f32 %v1254_v28, %v243_v7  ;;  %v282_v10 = vadd.f32 %v1025_v6, %v45_v4 }
  0xe6   :  { %v1027_v12 = vpop.eup %1026  ;;  %v956_v13 = vpop.f32.mrf.mxu0 }
  0xe7   :  { %1040 = vtanh.f32 %v244_v9  ;;  %v259_v15 = vadd.f32 %v956_v13, %v1254_v28  ;;  %979 = vmatprep.mubr.msk.f32.mxu1 %vm309_vm1, %v282_v10  ;;  %v285_v18 = vadd.f32 %v1027_v12, %v48_v11 }
  0xe8   :  { %v1029_v16 = vpop.eup %1028  ;;  %v253_v17 = vpop.f32.mrf.mxu0  ;;  %980 = vmatmul.mubr.msk.f32.gmra.mxu1 %vm309_vm1, %v283_v8 }
  0xe9   :  { %1042 = vtanh.f32 %v259_v15  ;;  %v254_v19 = vadd.f32 %v1254_v28, %v253_v17  ;;  %v284_v20 = vadd.f32 %v1029_v16, %v47_v14 }
  0xea   :  { %v1031_v22 = vpop.eup %1030 }
  0xeb   :  { %1044 = vtanh.f32 %v254_v19  ;;  %982 = vmatprep.mubr.msk.f32.mxu1 %vm309_vm1, %v284_v20  ;;  %v287_v25 = vadd.f32 %v1031_v22, %v50_v21 }
  0xec   :  { %v1033_v24 = vpop.eup %1032  ;;  %983 = vmatmul.mubr.msk.f32.gmra.mxu1 %vm309_vm1, %v285_v18 }
  0xed   :  { %v286_v26 = vadd.f32 %v1033_v24, %v49_v23 }
  0xee   :  { %v1035_v28 = vpop.eup %1034 }
  0xef   :  { %985 = vmatprep.mubr.msk.f32.mxu1 %vm309_vm1, %v286_v26  ;;  %v289_v31 = vadd.f32 %v1035_v28, %v52_v27 }
  0xf0   :  { %v1037_v30 = vpop.eup %1036  ;;  %986 = vmatmul.mubr.msk.f32.gmra.mxu1 %vm309_vm1, %v287_v25 }
  0xf1   :  { %v288_v32 = vadd.f32 %v1037_v30, %v51_v29 }
  0xf2   :  { %v1039_v34 = vpop.eup %1038 }
  0xf3   :  { %988 = vmatprep.mubr.msk.f32.mxu1 %vm309_vm1, %v288_v32  ;;  %v291_v37 = vadd.f32 %v1039_v34, %v54_v33 }
  0xf4   :  { %v1041_v36 = vpop.eup %1040  ;;  %989 = vmatmul.mubr.msk.f32.gmra.mxu1 %vm309_vm1, %v289_v31 }
  0xf5   :  { %v290_v38 = vadd.f32 %v1041_v36, %v53_v35 }
  0xf6   :  { %v1043_v40 = vpop.eup %1042 }
  0xf7   :  { %991 = vmatprep.mubr.msk.f32.mxu1 %vm309_vm1, %v290_v38  ;;  %v293_v43 = vadd.f32 %v1043_v40, %v56_v39 }
  0xf8   :  { %v1045_v42 = vpop.eup %1044  ;;  %992 = vmatmul.mubr.msk.f32.gmra.mxu1 %vm309_vm1, %v291_v37 }
  0xf9   :  { %v292_v44 = vadd.f32 %v1045_v42, %v55_v41 }
  0xfb   :  { %994 = vmatprep.mubr.msk.f32.mxu1 %vm309_vm1, %v292_v44 }
  0xfc   :  { %995 = vmatmul.mubr.msk.f32.gmra.mxu1 %vm309_vm1, %v293_v43 }
 0x1a0   :  { %v975_v46 = vpop.f32.mrf.mxu0 }
 0x1a1   :  { %v1342_v47 = vadd.f32 %v975_v46, %v1339_v45 }
 0x1a2   :  { %v424_v48 = vpop.f32.mrf.mxu0 }
 0x1a3   :  { %v520_v49 = vand.u32 2147483647, %v1342_v47  ;;  %744 = vst.msk [vmem:[%s1763_s6 + $0x8] sm:$0xff] %vm68_vm0, %v1342_v47  ;;  %v1351_v50 = vadd.f32 %v1339_v45, %v424_v48 }
 0x1a4   :  { %v978_v51 = vpop.f32.mrf.mxu1 }
 0x1a5   :  { %v536_v52 = vsub.f32 0.0, %v520_v49  ;;  %v519_v53 = vand.u32 2147483647, %v1351_v50  ;;  %743 = vst.msk [vmem:[%s1763_s6] sm:$0xff] %vm68_vm0, %v1351_v50  ;;  %v1360_v54 = vadd.f32 %v978_v51, %v1339_v45 }
 0x1a6   :  { %v434_v55 = vpop.f32.mrf.mxu1 }
 0x1a7   :  { %v553_v56 = vmul.f32 1.442695, %v536_v52  ;;  %v522_v57 = vand.u32 2147483647, %v1360_v54  ;;  %746 = vst.msk [vmem:[%s1763_s6 + $0x18] sm:$0xff] %vm68_vm0, %v1360_v54  ;;  %v1369_v58 = vadd.f32 %v1339_v45, %v434_v55  ;;  %v535_v60 = vsub.f32 0.0, %v519_v53 }
 0x1a8   :  { %v981_v59 = vpop.f32.mrf.mxu1 }
 0x1a9   :  { %1046 = vpow2.f32 %v553_v56  ;;  %v538_v61 = vsub.f32 0.0, %v522_v57  ;;  %745 = vst.msk [vmem:[%s1763_s6 + $0x10] sm:$0xff] %vm68_vm0, %v1369_v58  ;;  %v521_v62 = vand.u32 2147483647, %v1369_v58  ;;  %v1378_v63 = vadd.f32 %v981_v59, %v1339_v45 }
 0x1aa   :  { %v444_v0 = vpop.f32.mrf.mxu1  ;;  %v551_v5 = vmul.f32 1.442695, %v535_v60  ;;  %v503_v60 = vmax.f32 %v1351_v50, 0.0 }
 0x1ab   :  { %v557_v1 = vmul.f32 1.442695, %v538_v61  ;;  %v1381_v2 = vadd.f32 %v1339_v45, %v444_v0  ;;  %v524_v3 = vand.u32 2147483647, %v1378_v63  ;;  %748 = vst.msk [vmem:[%s1763_s6 + $0x28] sm:$0xff] %vm68_vm0, %v1378_v63  ;;  %v537_v6 = vsub.f32 0.0, %v521_v62 }
 0x1ac   :  { %v984_v4 = vpop.f32.mrf.mxu1  ;;  %v504_v61 = vmax.f32 %v1342_v47, 0.0 }
 0x1ad   :  { %v523_v7 = vand.u32 2147483647, %v1381_v2  ;;  %747 = vst.msk [vmem:[%s1763_s6 + $0x20] sm:$0xff] %vm68_vm0, %v1381_v2  ;;  %v1396_v8 = vadd.f32 %v984_v4, %v1339_v45  ;;  %1048 = vpow2.f32 %v557_v1  ;;  %v540_v12 = vsub.f32 0.0, %v524_v3 }
 0x1ae   :  { %v454_v9 = vpop.f32.mrf.mxu1  ;;  %1050 = vpow2.f32 %v551_v5  ;;  %v555_v14 = vmul.f32 1.442695, %v537_v6  ;;  %v506_v4 = vmax.f32 %v1360_v54, 0.0 }
 0x1af   :  { %v539_v10 = vsub.f32 0.0, %v523_v7  ;;  %750 = vst.msk [vmem:[%s1763_s6 + $0x38] sm:$0xff] %vm68_vm0, %v1396_v8  ;;  %v1404_v11 = vadd.f32 %v1339_v45, %v454_v9  ;;  %v526_v15 = vand.u32 2147483647, %v1396_v8  ;;  %v561_v22 = vmul.f32 1.442695, %v540_v12 }
 0x1b0   :  { %v987_v13 = vpop.f32.mrf.mxu1  ;;  %1052 = vpow2.f32 %v555_v14  ;;  %v508_v12 = vmax.f32 %v1378_v63, 0.0 }
 0x1b1   :  { %v525_v16 = vand.u32 2147483647, %v1404_v11  ;;  %749 = vst.msk [vmem:[%s1763_s6 + $0x30] sm:$0xff] %vm68_vm0, %v1404_v11  ;;  %v1414_v17 = vadd.f32 %v987_v13, %v1339_v45  ;;  %v559_v19 = vmul.f32 1.442695, %v539_v10  ;;  %v542_v24 = vsub.f32 0.0, %v526_v15 }
 0x1b2   :  { %v464_v18 = vpop.f32.mrf.mxu1  ;;  %v507_v13 = vmax.f32 %v1381_v2, 0.0  ;;  %v510_v15 = vmax.f32 %v1396_v8, 0.0 }
 0x1b3   :  { %v541_v20 = vsub.f32 0.0, %v525_v16  ;;  %v1417_v21 = vadd.f32 %v1339_v45, %v464_v18  ;;  %752 = vst.msk [vmem:[%s1763_s6 + $0x48] sm:$0xff] %vm68_vm0, %v1414_v17  ;;  %v528_v25 = vand.u32 2147483647, %v1414_v17  ;;  %1054 = vpow2.f32 %v559_v19 }
 0x1b4   :  { %v990_v23 = vpop.f32.mrf.mxu1  ;;  %1056 = vpow2.f32 %v561_v22  ;;  %v565_v35 = vmul.f32 1.442695, %v542_v24  ;;  %v509_v22 = vmax.f32 %v1404_v11, 0.0 }
 0x1b5   :  { %v527_v26 = vand.u32 2147483647, %v1417_v21  ;;  %751 = vst.msk [vmem:[%s1763_s6 + $0x40] sm:$0xff] %vm68_vm0, %v1417_v21  ;;  %v563_v28 = vmul.f32 1.442695, %v541_v20  ;;  %v1434_v29 = vadd.f32 %v990_v23, %v1339_v45  ;;  %v544_v36 = vsub.f32 0.0, %v528_v25 }
 0x1b6   :  { %v1431_v27 = vpop.eup %1046  ;;  %v474_v30 = vpop.f32.mrf.mxu1 }
 0x1b7   :  { %v543_v31 = vsub.f32 0.0, %v527_v26  ;;  %v1437_v32 = vadd.f32 %v1339_v45, %v474_v30  ;;  %754 = vst.msk [vmem:[%s1763_s6 + $0x58] sm:$0xff] %vm68_vm0, %v1434_v29  ;;  %v592_v34 = vadd.f32 1.0, %v1431_v27  ;;  %1058 = vpow2.f32 %v563_v28 }
 0x1b8   :  { %v993_v33 = vpop.f32.mrf.mxu1  ;;  %v530_v39 = vand.u32 2147483647, %v1434_v29  ;;  %v569_v49 = vmul.f32 1.442695, %v544_v36  ;;  %v595_v1 = vmul.f32 -0.5, %v1431_v27  ;;  %v512_v26 = vmax.f32 %v1414_v17, 0.0 }
 0x1b9   :  { %v529_v37 = vand.u32 2147483647, %v1437_v32  ;;  %753 = vst.msk [vmem:[%s1763_s6 + $0x50] sm:$0xff] %vm68_vm0, %v1437_v32  ;;  %v1452_v38 = vadd.f32 %v993_v33, %v1339_v45  ;;  %v567_v42 = vmul.f32 1.442695, %v543_v31  ;;  %1060 = vlog2.f32 %v592_v34 }
 0x1ba   :  { %v484_v40 = vpop.f32.mrf.mxu1  ;;  %v1455_v41 = vpop.eup %1048  ;;  %1062 = vpow2.f32 %v565_v35  ;;  %v546_v53 = vsub.f32 0.0, %v530_v39  ;;  %v596_v18 = vadd.f32 1.0, %v595_v1  ;;  %v598_v24 = vand.u32 2147483647, %v1431_v27 }
 0x1bb   :  { %v545_v43 = vsub.f32 0.0, %v529_v37  ;;  %756 = vst.msk [vmem:[%s1763_s6 + $0x68] sm:$0xff] %vm68_vm0, %v1452_v38  ;;  %v532_v44 = vand.u32 2147483647, %v1452_v38  ;;  %v1464_v46 = vadd.f32 %v1339_v45, %v484_v40  ;;  %v1469_v52 = vpop.eup %1050  ;;  %v610_v59 = vadd.f32 1.0, %v1455_v41 }
 0x1bc   :  { %v996_v48 = vpop.f32.mrf.mxu1  ;;  %1064 = vpow2.f32 %v567_v42  ;;  %v583_v5 = vadd.f32 1.0, %v1469_v52  ;;  %v573_v7 = vmul.f32 1.442695, %v546_v53  ;;  %v613_v19 = vmul.f32 -0.5, %v1455_v41 }
 0x1bd   :  { %v1467_v51 = vadd.f32 %v996_v48, %v1339_v45  ;;  %v571_v55 = vmul.f32 1.442695, %v545_v43  ;;  %v531_v56 = vand.u32 2147483647, %v1464_v46  ;;  %755 = vst.msk [vmem:[%s1763_s6 + $0x60] sm:$0xff] %vm68_vm0, %v1464_v46  ;;  %v548_v62 = vsub.f32 0.0, %v532_v44  ;;  %v1492_v6 = vpop.eup %1052 }
 0x1be   :  { %v494_v57 = vpop.f32.mrf.mxu1  ;;  %1066 = vlog2.f32 %v610_v59  ;;  %v601_v25 = vadd.f32 1.0, %v1492_v6  ;;  %v616_v33 = vand.u32 2147483647, %v1455_v41  ;;  %v586_v34 = vmul.f32 -0.5, %v1469_v52 }
 0x1bf   :  { %758 = vst.msk [vmem:[%s1763_s6 + $0x78] sm:$0xff] %vm68_vm0, %v1467_v51  ;;  %v1486_v0 = vadd.f32 %v1339_v45, %v494_v57  ;;  %1068 = vpow2.f32 %v569_v49  ;;  %v534_v3 = vand.u32 2147483647, %v1467_v51  ;;  %v547_v9 = vsub.f32 0.0, %v531_v56 }
 0x1c0   :  { %1070 = vpow2.f32 %v571_v55  ;;  %v505_v45 = vmax.f32 %v1369_v58, 0.0  ;;  %v1503_v14 = vpop.eup %1054  ;;  %v577_v16 = vmul.f32 1.442695, %v548_v62  ;;  %v511_v36 = vmax.f32 %v1417_v21, 0.0 }
 0x1c1   :  { %v533_v10 = vand.u32 2147483647, %v1486_v0  ;;  %757 = vst.msk [vmem:[%s1763_s6 + $0x70] sm:$0xff] %vm68_vm0, %v1486_v0  ;;  %1072 = vlog2.f32 %v583_v5  ;;  %v1507_v20 = vpop.eup %1056  ;;  %v550_v23 = vsub.f32 0.0, %v534_v3  ;;  %v575_v28 = vmul.f32 1.442695, %v547_v9 }
 0x1c2   :  { %1074 = vpow2.f32 %v573_v7  ;;  %v619_v35 = vadd.f32 1.0, %v1503_v14  ;;  %v597_v37 = vmul.f32 %v1431_v27, %v596_v18  ;;  %v614_v39 = vadd.f32 1.0, %v613_v19  ;;  %s1110_s6 = smov 96  }
 0x1c3   :  { %v549_v30 = vsub.f32 0.0, %v533_v10  ;;  %1076 = vlog2.f32 %v601_v25  ;;  %v581_v42 = vmul.f32 1.442695, %v550_v23  ;;  %vm1520_vm2 = vcmp.lt.f32.partialorder %v598_v24, 0.0004427343 }
 0x1c4   :  { %v1513_v31 = vpop.eup %1058  ;;  %1078 = vpow2.f32 %v577_v16  ;;  %v628_v44 = vadd.f32 1.0, %v1507_v20  ;;  %vm1528_vm3 = vcmp.lt.f32.partialorder %v616_v33, 0.0004427343  ;;  %v587_v27 = vadd.f32 1.0, %v586_v34 }
 0x1c5   :  { %1080 = vlog2.f32 %v619_v35  ;;  %v579_v49 = vmul.f32 1.442695, %v549_v30  ;;  %v637_v55 = vadd.f32 1.0, %v1513_v31  ;;  %v589_v57 = vand.u32 2147483647, %v1469_v52 }
 0x1c6   :  { %v1061_v40 = vpop.eup %1060  ;;  %1082 = vpow2.f32 %v575_v28  ;;  %v615_v1 = vmul.f32 %v1455_v41, %v614_v39  ;;  %v604_v3 = vmul.f32 -0.5, %v1492_v6  ;;  %v607_v9 = vand.u32 2147483647, %v1492_v6 }
 0x1c7   :  { %v1525_v48 = vpop.eup %1062  ;;  %v594_v53 = vmul.f32 0.6931472, %v1061_v40  ;;  %1084 = vlog2.f32 %v628_v44  ;;  %v622_v10 = vmul.f32 -0.5, %v1503_v14  ;;  %v631_v19 = vmul.f32 -0.5, %v1507_v20 }
 0x1c8   :  { %1086 = vlog2.f32 %v637_v55  ;;  %v646_v41 = vadd.f32 1.0, %v1525_v48  ;;  %v588_v47 = vmul.f32 %v1469_v52, %v587_v27  ;;  %vm1551_vm4 = vcmp.lt.f32.partialorder %v589_v57, 0.0004427343 }
 0x1c9   :  { %v1533_v59 = vpop.eup %1064  ;;  %v600_v62 = vsel %vm1520_vm2, %v597_v37, %v594_v53  ;;  %1088 = vpow2.f32 %v581_v42  ;;  %v640_v24 = vmul.f32 -0.5, %v1513_v31  ;;  %v605_v33 = vadd.f32 1.0, %v604_v3 }
 0x1ca   :  { %v728_v7 = vadd.f32 %v600_v62, %v504_v61  ;;  %1090 = vpow2.f32 %v579_v49  ;;  %v655_v25 = vadd.f32 1.0, %v1533_v59  ;;  %v625_v34 = vand.u32 2147483647, %v1503_v14 }
 0x1cb   :  { %v1067_v5 = vpop.eup %1066  ;;  %1092 = vlog2.f32 %v646_v41  ;;  %v623_v37 = vadd.f32 1.0, %v622_v10  ;;  %vm1562_vm5 = vcmp.lt.f32.partialorder %v607_v9, 0.0004427343  ;;  %v632_v40 = vadd.f32 1.0, %v631_v19 }
 0x1cc   :  { %v1543_v16 = vpop.eup %1068  ;;  %v612_v18 = vmul.f32 0.6931472, %v1067_v5  ;;  %777 = vrot.lane.b32.xlu0 %v728_v7, %s1110_s6  ;;  %1094 = vlog2.f32 %v655_v25  ;;  %v634_v42 = vand.u32 2147483647, %v1507_v20  ;;  %v643_v49 = vand.u32 2147483647, %v1513_v31 }
 0x1cd   :  { %v1547_v23 = vpop.eup %1070  ;;  %v664_v43 = vadd.f32 1.0, %v1543_v16  ;;  %v606_v27 = vmul.f32 %v1492_v6, %v605_v33  ;;  %v649_v57 = vmul.f32 -0.5, %v1525_v48  ;;  %v624_v3 = vmul.f32 %v1503_v14, %v623_v37 }
 0x1ce   :  { %v1073_v28 = vpop.eup %1072  ;;  %v618_v30 = vsel %vm1528_vm3, %v615_v1, %v612_v18  ;;  %v673_v53 = vadd.f32 1.0, %v1547_v23  ;;  %vm1582_vm6 = vcmp.lt.f32.partialorder %v625_v34, 0.0004427343  ;;  %v633_v50 = vmul.f32 %v1507_v20, %v632_v40 }
 0x1cf   :  { %v730_v35 = vadd.f32 %v618_v30, %v506_v4  ;;  %v585_v52 = vmul.f32 0.6931472, %v1073_v28  ;;  %v1568_v44 = vpop.eup %1074  ;;  %v641_v4 = vadd.f32 1.0, %v640_v24  ;;  %1096 = vlog2.f32 %v664_v43 }
 0x1d0   :  { %v1077_v55 = vpop.eup %1076  ;;  %1098 = vlog2.f32 %v673_v53  ;;  %vm1588_vm7 = vcmp.lt.f32.partialorder %v634_v42, 0.0004427343  ;;  %v658_v6 = vmul.f32 -0.5, %v1533_v59  ;;  %v682_v9 = vadd.f32 1.0, %v1568_v44 }
 0x1d1   :  { %781 = vrot.lane.b32.xlu1 %v730_v35, %s1110_s6  ;;  %v591_v54 = vsel %vm1551_vm4, %v588_v47, %v585_v52  ;;  %v1579_v62 = vpop.eup %1078  ;;  %v603_v1 = vmul.f32 0.6931472, %v1077_v55  ;;  %v642_v19 = vmul.f32 %v1513_v31, %v641_v4  ;;  %vm1599_vm8 = vcmp.lt.f32.partialorder %v643_v49, 0.0004427343 }
 0x1d2   :  { %v727_v56 = vadd.f32 %v591_v54, %v503_v60  ;;  %v1081_v7 = vpop.eup %1080  ;;  %v650_v61 = vadd.f32 1.0, %v649_v57  ;;  %v652_v24 = vand.u32 2147483647, %v1525_v48  ;;  %1100 = vlog2.f32 %v682_v9 }
 0x1d3   :  { %v1594_v10 = vpop.eup %1082  ;;  %v609_v14 = vsel %vm1562_vm5, %v606_v27, %v603_v1  ;;  %v621_v18 = vmul.f32 0.6931472, %v1081_v7  ;;  %v661_v33 = vand.u32 2147483647, %v1533_v59  ;;  %v667_v31 = vmul.f32 -0.5, %v1543_v16 }
 0x1d4   :  { %775 = vrot.lane.b32.xlu0 %v727_v56, %s1110_s6  ;;  %v1085_v20 = vpop.eup %1084  ;;  %v729_v47 = vadd.f32 %v609_v14, %v505_v45  ;;  %v659_v35 = vadd.f32 1.0, %v658_v6  ;;  %v691_v52 = vadd.f32 1.0, %v1594_v10  ;;  %v670_v40 = vand.u32 2147483647, %v1543_v16 }
 0x1d5   :  { %v1087_v25 = vpop.eup %1086  ;;  %v627_v28 = vsel %vm1582_vm6, %v624_v3, %v621_v18  ;;  %v630_v30 = vmul.f32 0.6931472, %v1085_v20  ;;  %v676_v42 = vmul.f32 -0.5, %v1547_v23  ;;  %v700_v43 = vadd.f32 1.0, %v1579_v62 }
 0x1d6   :  { %v1610_v34 = vpop.eup %1088  ;;  %779 = vrot.lane.b32.xlu1 %v729_v47, %s1110_s6  ;;  %v731_v58 = vadd.f32 %v627_v28, %v507_v13  ;;  %v639_v45 = vmul.f32 0.6931472, %v1087_v25  ;;  %vm1628_vm9 = vcmp.lt.f32.partialorder %v652_v24, 0.0004427343  ;;  %1102 = vlog2.f32 %v691_v52 }
 0x1d7   :  { %v1616_v37 = vpop.eup %1090  ;;  %v636_v39 = vsel %vm1588_vm7, %v633_v50, %v630_v30  ;;  %v668_v53 = vadd.f32 1.0, %v667_v31  ;;  %v685_v55 = vmul.f32 -0.5, %v1568_v44  ;;  %1104 = vlog2.f32 %v700_v43 }
 0x1d8   :  { %783 = vrot.lane.b32.xlu0 %v731_v58, %s1110_s6  ;;  %v732_v2 = vadd.f32 %v636_v39, %v508_v12  ;;  %v645_v13 = vsel %vm1599_vm8, %v642_v19, %v639_v45  ;;  %v1093_v4 = vpop.eup %1092  ;;  %v651_v12 = vmul.f32 %v1525_v48, %v650_v61  ;;  %vm1637_vm10 = vcmp.lt.f32.partialorder %v661_v33, 0.0004427343 }
 0x1d9   :  { %v733_v49 = vadd.f32 %v645_v13, %v509_v22  ;;  %v1095_v56 = vpop.eup %1094  ;;  %v648_v63 = vmul.f32 0.6931472, %v1093_v4  ;;  %v709_v57 = vadd.f32 1.0, %v1616_v37  ;;  %v660_v11 = vmul.f32 %v1533_v59, %v659_v35 }
 0x1da   :  { %785 = vrot.lane.b32.xlu1 %v732_v2, %s1110_s6  ;;  %v657_v1 = vmul.f32 0.6931472, %v1095_v56  ;;  %vm1643_vm11 = vcmp.lt.f32.partialorder %v670_v40, 0.0004427343  ;;  %v677_v3 = vadd.f32 1.0, %v676_v42  ;;  %v718_v7 = vadd.f32 1.0, %v1610_v34 }
 0x1db   :  { %v654_v5 = vsel %vm1628_vm9, %v651_v12, %v648_v63  ;;  %v679_v48 = vand.u32 2147483647, %v1547_v23  ;;  %1106 = vlog2.f32 %v709_v57  ;;  %v669_v6 = vmul.f32 %v1543_v16, %v668_v53 }
 0x1dc   :  { %787 = vrot.lane.b32.xlu0 %v733_v49, %s1110_s6  ;;  %v1097_v50 = vpop.eup %1096  ;;  %v734_v60 = vadd.f32 %v654_v5, %v510_v15  ;;  %v663_v59 = vsel %vm1637_vm10, %v660_v11, %v657_v1  ;;  %v686_v9 = vadd.f32 1.0, %v685_v55  ;;  %v694_v41 = vmul.f32 -0.5, %v1594_v10 }
 0x1dd   :  { %v1099_v14 = vpop.eup %1098  ;;  %v735_v18 = vadd.f32 %v663_v59, %v511_v36  ;;  %v666_v19 = vmul.f32 0.6931472, %v1097_v50  ;;  %1108 = vlog2.f32 %v718_v7  ;;  %v678_v8 = vmul.f32 %v1547_v23, %v677_v3 }
 0x1de   :  { %789 = vrot.lane.b32.xlu1 %v734_v60, %s1110_s6  ;;  %v675_v20 = vmul.f32 0.6931472, %v1099_v14  ;;  %v688_v15 = vand.u32 2147483647, %v1568_v44  ;;  %v703_v47 = vmul.f32 -0.5, %v1579_v62  ;;  %v513_v16 = vmax.f32 %v1437_v32, 0.0 }
 0x1df   :  { %v672_v21 = vsel %vm1643_vm11, %v669_v6, %v666_v19  ;;  %vm680_vm12 = vcmp.lt.f32.partialorder %v679_v48, 0.0004427343  ;;  %v1101_v36 = vpop.eup %1100  ;;  %v687_v25 = vmul.f32 %v1568_v44, %v686_v9  ;;  %v695_v30 = vadd.f32 1.0, %v694_v41 }
 0x1e0   :  { %791 = vrot.lane.b32.xlu0 %v735_v18, %s1110_s6  ;;  %v736_v61 = vadd.f32 %v672_v21, %v512_v26  ;;  %v681_v24 = vsel %vm680_vm12, %v678_v8, %v675_v20  ;;  %v684_v28 = vmul.f32 0.6931472, %v1101_v36  ;;  %v712_v33 = vmul.f32 -0.5, %v1616_v37 }
 0x1e1   :  { %v737_v23 = vadd.f32 %v681_v24, %v513_v16  ;;  %v514_v32 = vmax.f32 %v1434_v29, 0.0  ;;  %vm689_vm13 = vcmp.lt.f32.partialorder %v688_v15, 0.0004427343  ;;  %v697_v31 = vand.u32 2147483647, %v1594_v10 }
 0x1e2   :  { %793 = vrot.lane.b32.xlu1 %v736_v61, %s1110_s6  ;;  %v704_v58 = vadd.f32 1.0, %v703_v47  ;;  %v690_v17 = vsel %vm689_vm13, %v687_v25, %v684_v28  ;;  %v706_v26 = vand.u32 2147483647, %v1579_v62  ;;  %v721_v44 = vmul.f32 -0.5, %v1610_v34 }
 0x1e3   :  { %v1103_v45 = vpop.eup %1102  ;;  %v738_v35 = vadd.f32 %v690_v17, %v514_v32  ;;  %v515_v39 = vmax.f32 %v1464_v46, 0.0  ;;  %v696_v29 = vmul.f32 %v1594_v10, %v695_v30  ;;  %v713_v42 = vadd.f32 1.0, %v712_v33 }
 0x1e4   :  { %795 = vrot.lane.b32.xlu0 %v737_v23, %s1110_s6  ;;  %v1105_v52 = vpop.eup %1104  ;;  %v693_v40 = vmul.f32 0.6931472, %v1103_v45  ;;  %vm698_vm14 = vcmp.lt.f32.partialorder %v697_v31, 0.0004427343  ;;  %v705_v2 = vmul.f32 %v1579_v62, %v704_v58  ;;  %v715_v13 = vand.u32 2147483647, %v1616_v37 }
 0x1e5   :  { %v702_v43 = vmul.f32 0.6931472, %v1105_v52  ;;  %v516_v54 = vmax.f32 %v1452_v38, 0.0  ;;  %vm707_vm15 = vcmp.lt.f32.partialorder %v706_v26, 0.0004427343  ;;  %v722_v49 = vadd.f32 1.0, %v721_v44 }
 0x1e6   :  { %797 = vrot.lane.b32.xlu1 %v738_v35, %s1110_s6  ;;  %v699_v4 = vsel %vm698_vm14, %v696_v29, %v693_v40  ;;  %v724_v56 = vand.u32 2147483647, %v1610_v34  ;;  %v714_v12 = vmul.f32 %v1616_v37, %v713_v42  ;;  %v517_v57 = vmax.f32 %v1486_v0, 0.0 }
 0x1e7   :  { %v739_v55 = vadd.f32 %v699_v4, %v515_v39  ;;  %v708_v46 = vsel %vm707_vm15, %v705_v2, %v702_v43  ;;  %vm716_vm1 = vcmp.lt.f32.partialorder %v715_v13, 0.0004427343  ;;  %v723_v1 = vmul.f32 %v1610_v34, %v722_v49 }
 0x1e8   :  { %v1107_v53 = vpop.eup %1106  ;;  %v740_v10 = vadd.f32 %v708_v46, %v516_v54  ;;  %v518_v11 = vmax.f32 %v1467_v51, 0.0  ;;  %vm725_vm2 = vcmp.lt.f32.partialorder %v724_v56, 0.0004427343 }
 0x1e9   :  { %v711_v63 = vmul.f32 0.6931472, %v1107_v53  ;;  %799 = vrot.lane.b32.xlu0 %v739_v55, %s1110_s6 }
 0x1ea   :  { %v1109_v27 = vpop.eup %1108  ;;  %801 = vrot.lane.b32.xlu1 %v740_v10, %s1110_s6 }
 0x1eb   :  { %v717_v38 = vsel %vm716_vm1, %v714_v12, %v711_v63  ;;  %v720_v62 = vmul.f32 0.6931472, %v1109_v27 }
 0x1ec   :  { %v741_v22 = vadd.f32 %v717_v38, %v517_v57 }
 0x1ed   :  { %v726_v3 = vsel %vm725_vm2, %v723_v1, %v720_v62 }
 0x1ee   :  { %803 = vrot.lane.b32.xlu0 %v741_v22, %s1110_s6  ;;  %v742_v37 = vadd.f32 %v726_v3, %v518_v11 }
 0x1f0   :  { %805 = vrot.lane.b32.xlu1 %v742_v37, %s1110_s6 }
 0x23e   :  { %v778_v0 = vpop.permute.xlu0 %777 }
 0x23f   :  { %824 = vst.msk [vmem:[%s1764_s7 + $0x8] sm:$0xff] %vm68_vm0, %v778_v0 }
 0x243   :  { %v782_v5 = vpop.permute.xlu1 %781 }
 0x244   :  { %826 = vst.msk [vmem:[%s1764_s7 + $0x18] sm:$0xff] %vm68_vm0, %v782_v5 }
 0x246   :  { %v776_v51 = vpop.permute.xlu0 %775 }
 0x247   :  { %823 = vst.msk [vmem:[%s1764_s7] sm:$0xff] %vm68_vm0, %v776_v51 }
 0x248   :  { %v780_v34 = vpop.permute.xlu1 %779 }
 0x249   :  { %825 = vst.msk [vmem:[%s1764_s7 + $0x10] sm:$0xff] %vm68_vm0, %v780_v34 }
 0x24a   :  { %v784_v48 = vpop.permute.xlu0 %783 }
 0x24b   :  { %827 = vst.msk [vmem:[%s1764_s7 + $0x20] sm:$0xff] %vm68_vm0, %v784_v48 }
 0x24c   :  { %v786_v7 = vpop.permute.xlu1 %785 }
 0x24d   :  { %828 = vst.msk [vmem:[%s1764_s7 + $0x28] sm:$0xff] %vm68_vm0, %v786_v7 }
 0x24e   :  { %v788_v50 = vpop.permute.xlu0 %787 }
 0x24f   :  { %829 = vst.msk [vmem:[%s1764_s7 + $0x30] sm:$0xff] %vm68_vm0, %v788_v50 }
 0x250   :  { %v790_v60 = vpop.permute.xlu1 %789 }
 0x251   :  { %830 = vst.msk [vmem:[%s1764_s7 + $0x38] sm:$0xff] %vm68_vm0, %v790_v60 }
 0x252   :  { %v792_v59 = vpop.permute.xlu0 %791 }
 0x253   :  { %831 = vst.msk [vmem:[%s1764_s7 + $0x40] sm:$0xff] %vm68_vm0, %v792_v59 }
 0x254   :  { %v794_v6 = vpop.permute.xlu1 %793 }
 0x255   :  { %832 = vst.msk [vmem:[%s1764_s7 + $0x48] sm:$0xff] %vm68_vm0, %v794_v6 }
 0x256   :  { %v796_v9 = vpop.permute.xlu0 %795 }
 0x257   :  { %833 = vst.msk [vmem:[%s1764_s7 + $0x50] sm:$0xff] %vm68_vm0, %v796_v9 }
 0x258   :  { %v798_v14 = vpop.permute.xlu1 %797 }
 0x259   :  { %834 = vst.msk [vmem:[%s1764_s7 + $0x58] sm:$0xff] %vm68_vm0, %v798_v14 }
 0x25b   :  { %v800_v18 = vpop.permute.xlu0 %799 }
 0x25c   :  { %835 = vst.msk [vmem:[%s1764_s7 + $0x60] sm:$0xff] %vm68_vm0, %v800_v18  ;;  %v802_v19 = vpop.permute.xlu1 %801 }
 0x25d   :  { %836 = vst.msk [vmem:[%s1764_s7 + $0x68] sm:$0xff] %vm68_vm0, %v802_v19 }
 0x260   :  { %v804_v41 = vpop.permute.xlu0 %803 }
 0x261   :  { %837 = vst.msk [vmem:[%s1764_s7 + $0x70] sm:$0xff] %vm68_vm0, %v804_v41 }
 0x262   :  { %v806_v20 = vpop.permute.xlu1 %805 }
 0x263   :  { %838 = vst.msk [vmem:[%s1764_s7 + $0x78] sm:$0xff] %vm68_vm0, %v806_v20 }

</bundles_post_ra>
